<compile_context>
chip_gen: v6e
topology: v6e:2x2x1
jax: 0.10.0
libtpu: 0.0.40
codegen_flags: <defaults>
</compile_context>

<pallas_src>
import functools

import jax
import jax.numpy as jnp
from jax import lax
from jax.experimental import pallas as pl
from jax.experimental.pallas import tpu as pltpu


def _shift_lanes(x, offset):
    """out[:, i] = x[:, i + offset] when in range, else 0 (static offset)."""
    n = x.shape[-1]
    if offset == 0:
        return x
    pad = jnp.zeros((x.shape[0], abs(offset)), dtype=x.dtype)
    if offset > 0:
        return jnp.concatenate([x[:, offset:], pad], axis=-1)
    return jnp.concatenate([pad, x[:, : n + offset]], axis=-1)


def _conv3x3_im2col_kernel(x_ref, w_ref, b_ref, wcol_ref, o_ref, *, H, W,
                           C_in, C_out, compute_dtype):
    """One batch element per grid step.

    x_ref    : (1, C_in, H*W)   input, spatial flattened onto the lane axis
    w_ref    : (C_out, 9*C_in)  conv weights, tap-major / channel-minor
    b_ref    : (C_out, 1)       bias (f32)
    wcol_ref : (1, H*W)         int32 w-coordinate of every lane
    o_ref    : (1, C_out, H*W)  conv output (pre pixel-shuffle), lane-dense
    """
    x = x_ref[0].astype(compute_dtype)          # (C_in, H*W)
    wcol = wcol_ref[...]                        # (1, H*W) int32

    # Build the (9*C_in, H*W) im2col patch matrix. For tap (dy, dx) the value at
    # output position (h, w) is x[c, h+dy-1, w+dx-1] with zero padding outside.
    # Row (dy) shifts move by whole rows so out-of-range positions fall off the
    # flat array and are zero-filled by _shift_lanes; only the dx taps need a
    # border mask on the w coordinate (row-boundary wrap).
    taps = []
    for dy in range(3):
        for dx in range(3):
            oy, ox = dy - 1, dx - 1
            t = _shift_lanes(x, oy * W + ox)
            if ox != 0:
                valid = (wcol + ox >= 0) & (wcol + ox < W)
                t = jnp.where(valid, t, jnp.zeros_like(t))
            taps.append(t)
    patches = jnp.concatenate(taps, axis=0)     # (9*C_in, H*W)

    # Single MXU matmul: M=C_out, K=9*C_in, N=H*W (lane-dense), f32 accumulate.
    acc = jnp.dot(w_ref[...].astype(compute_dtype), patches,
                  preferred_element_type=jnp.float32)       # (C_out, H*W) f32
    acc = acc + b_ref[...]                                   # f32 bias epilogue
    o_ref[0] = acc.astype(o_ref.dtype)


def conv3x3_same_pallas(x_nchw, w_oihw, bias, *, compute_dtype=jnp.bfloat16):
    """3x3 'same' conv in NCHW; returns the result flattened as (N, C_out, H*W)."""
    N, C_in, H, W = x_nchw.shape
    C_out = w_oihw.shape[0]
    HW = H * W

    x_flat = x_nchw.reshape(N, C_in, HW)                      # free reshape
    # OIHW -> (C_out, (dy, dx, c)) : matches the tap-major patch row order.
    w2d = jnp.transpose(w_oihw, (0, 2, 3, 1)).reshape(C_out, 9 * C_in)
    w2d = w2d.astype(compute_dtype)
    b2d = bias.reshape(C_out, 1).astype(jnp.float32)
    wcol = (jnp.arange(HW, dtype=jnp.int32) % W).reshape(1, HW)

    kernel = functools.partial(
        _conv3x3_im2col_kernel, H=H, W=W, C_in=C_in, C_out=C_out,
        compute_dtype=compute_dtype)

    # TODO(synk): for real CARN shapes (C=64, H=W>=256) add row tiling
    # grid=(N, H//TH) with a 1-row halo and a VMEM f32 accumulator scratch so the
    # double-buffered per-step footprint stays inside v7x's 64 MiB VMEM.
    return pl.pallas_call(
        kernel,
        out_shape=jax.ShapeDtypeStruct((N, C_out, HW), x_nchw.dtype),
        grid_spec=pltpu.PrefetchScalarGridSpec(
            num_scalar_prefetch=0,
            grid=(N,),
            in_specs=[
                pl.BlockSpec((1, C_in, HW), lambda n: (n, 0, 0)),
                pl.BlockSpec((C_out, 9 * C_in), lambda n: (0, 0)),
                pl.BlockSpec((C_out, 1), lambda n: (0, 0)),
                pl.BlockSpec((1, HW), lambda n: (0, 0)),
            ],
            out_specs=pl.BlockSpec((1, C_out, HW), lambda n: (n, 0, 0)),
        ),
        compiler_params=pltpu.CompilerParams(
            dimension_semantics=("parallel",)),
    )(x_flat, w2d, b2d, wcol)


def upsample_block(x_nchw, w_oihw, bias, channels, r, *,
                   compute_dtype=jnp.bfloat16):
    """Full UpsampleBlock forward: (N, C, H, W) -> (N, C, H*r, W*r)."""
    N, _, H, W = x_nchw.shape
    y = conv3x3_same_pallas(x_nchw, w_oihw, bias, compute_dtype=compute_dtype)
    # PixelShuffle: channel o = c*r*r + i*r + j -> pixel (h*r + i, w*r + j).
    # TODO(synk): fully fusing this interleave into the kernel output write needs
    # a lane-crossing 5-D transpose (or stride-r lane stores) that Mosaic does
    # not lower cleanly; kept as a single XLA transpose over the conv output.
    y = y.reshape(N, channels, r, r, H, W)
    y = jnp.transpose(y, (0, 1, 4, 2, 5, 3))
    return y.reshape(N, channels, H * r, W * r)


def reference_upsample_block(x_nchw, w_oihw, bias, channels, r):
    y = lax.conv_general_dilated(
        x_nchw, w_oihw, window_strides=(1, 1), padding=((1, 1), (1, 1)),
        dimension_numbers=("NCHW", "OIHW", "NCHW"),
    ) + bias.reshape(1, -1, 1, 1)
    N, _, H, W = x_nchw.shape
    y = y.reshape(N, channels, r, r, H, W)
    y = jnp.transpose(y, (0, 1, 4, 2, 5, 3))
    return y.reshape(N, channels, H * r, W * r)


if __name__ == "__main__":
    # Small shapes consistent with the module: batch=2, channels=4, spatial=16, r=2.
    N, C, H, W = 2, 4, 16, 16
    r = 2
    C_out = C * r * r

    key = jax.random.PRNGKey(0)
    kx, kw, kb = jax.random.split(key, 3)
    x = jax.random.normal(kx, (N, C, H, W), dtype=jnp.float32)
    # Conv2d weight layout: (C_out, C_in, 3, 3).
    w = jax.random.normal(kw, (C_out, C, 3, 3), dtype=jnp.float32) * 0.1
    b = jax.random.normal(kb, (C_out,), dtype=jnp.float32) * 0.1

    ref = jax.block_until_ready(reference_upsample_block(x, w, b, C, r))

    # Exact-path check (f32 MXU) validates the im2col / masking / shuffle logic.
    out_f32 = jax.block_until_ready(
        upsample_block(x, w, b, C, r, compute_dtype=jnp.float32))
    assert out_f32.shape == (N, C, H * r, W * r), out_f32.shape
    assert jnp.allclose(out_f32, ref, atol=1e-3, rtol=1e-3), "f32 mismatch vs reference"

    # Default fast path: bf16 MXU inputs with f32 accumulation (looser tolerance).
    out_bf16 = jax.block_until_ready(
        upsample_block(x, w, b, C, r, compute_dtype=jnp.bfloat16))
    assert out_bf16.shape == (N, C, H * r, W * r), out_bf16.shape
    assert jnp.allclose(out_bf16, ref, atol=5e-2, rtol=5e-2), "bf16 mismatch vs reference"

    print("KERNEL_OK")
</pallas_src>

<mosaic_0001>
module attributes {stable_mosaic.version = 11 : i64} {
  func.func @_conv3x3_im2col_kernel(%arg0: i32, %arg1: memref<1x4x256xf32, #tpu.memory_space<vmem>>, %arg2: memref<16x36xf32, #tpu.memory_space<vmem>>, %arg3: memref<16x1xf32, #tpu.memory_space<vmem>>, %arg4: memref<1x256xi32, #tpu.memory_space<vmem>>, %arg5: memref<1x16x256xf32, #tpu.memory_space<vmem>>) attributes {dimension_semantics = [#tpu.dimension_semantics<parallel>], iteration_bounds = array<i64: 2>, scalar_prefetch = 0 : i64, scratch_operands = 0 : i64, tpu.core_type = #tpu.core_type<tc>, window_params = [{transform_indices = @transform_0, window_bounds = array<i64: 1, 4, 256>}, {pipeline_mode = #tpu.pipeline_mode<synchronous>, transform_indices = @transform_1, window_bounds = array<i64: 16, 36>}, {pipeline_mode = #tpu.pipeline_mode<synchronous>, transform_indices = @transform_2, window_bounds = array<i64: 16, 1>}, {pipeline_mode = #tpu.pipeline_mode<synchronous>, transform_indices = @transform_3, window_bounds = array<i64: 1, 256>}, {transform_indices = @transform_4, window_bounds = array<i64: 1, 16, 256>}]} {
    %c0 = arith.constant 0 : index
    %c0_0 = arith.constant 0 : index
    %c0_1 = arith.constant 0 : index
    %0 = vector.load %arg1[%c0, %c0_0, %c0_1] : memref<1x4x256xf32, #tpu.memory_space<vmem>>, vector<1x4x256xf32>
    %1 = vector.shape_cast %0 : vector<1x4x256xf32> to vector<4x256xf32>
    %c0_2 = arith.constant 0 : index
    %c0_3 = arith.constant 0 : index
    %2 = vector.load %arg4[%c0_2, %c0_3] : memref<1x256xi32, #tpu.memory_space<vmem>>, vector<1x256xi32>
    %cst = arith.constant 0.000000e+00 : f32
    %3 = vector.broadcast %cst : f32 to vector<4x17xf32>
    %4 = vector.extract_strided_slice %1 {offsets = [0, 0], sizes = [4, 239], strides = [1, 1]} : vector<4x256xf32> to vector<4x239xf32>
    %5 = tpu.concatenate %3, %4 in 1 : vector<4x17xf32>, vector<4x239xf32> -> vector<4x256xf32>
    %c-1_i32 = arith.constant -1 : i32
    %6 = vector.broadcast %c-1_i32 : i32 to vector<1x256xi32>
    %7 = arith.addi %2, %6 : vector<1x256xi32>
    %c0_i32 = arith.constant 0 : i32
    %8 = vector.broadcast %c0_i32 : i32 to vector<1x256xi32>
    %9 = arith.cmpi sge, %7, %8 : vector<1x256xi32>
    %c-1_i32_4 = arith.constant -1 : i32
    %10 = vector.broadcast %c-1_i32_4 : i32 to vector<1x256xi32>
    %11 = arith.addi %2, %10 : vector<1x256xi32>
    %c16_i32 = arith.constant 16 : i32
    %12 = vector.broadcast %c16_i32 : i32 to vector<1x256xi32>
    %13 = arith.cmpi slt, %11, %12 : vector<1x256xi32>
    %14 = arith.andi %9, %13 : vector<1x256xi1>
    %cst_5 = arith.constant 0.000000e+00 : f32
    %15 = vector.broadcast %cst_5 : f32 to vector<4x256xf32>
    %16 = vector.shape_cast %14 : vector<1x256xi1> to vector<1x256xi1>
    %17 = vector.broadcast %16 : vector<1x256xi1> to vector<4x256xi1>
    %18 = arith.select %17, %5, %15 : vector<4x256xi1>, vector<4x256xf32>
    %cst_6 = arith.constant 0.000000e+00 : f32
    %19 = vector.broadcast %cst_6 : f32 to vector<4x16xf32>
    %20 = vector.extract_strided_slice %1 {offsets = [0, 0], sizes = [4, 240], strides = [1, 1]} : vector<4x256xf32> to vector<4x240xf32>
    %21 = tpu.concatenate %19, %20 in 1 : vector<4x16xf32>, vector<4x240xf32> -> vector<4x256xf32>
    %cst_7 = arith.constant 0.000000e+00 : f32
    %22 = vector.broadcast %cst_7 : f32 to vector<4x15xf32>
    %23 = vector.extract_strided_slice %1 {offsets = [0, 0], sizes = [4, 241], strides = [1, 1]} : vector<4x256xf32> to vector<4x241xf32>
    %24 = tpu.concatenate %22, %23 in 1 : vector<4x15xf32>, vector<4x241xf32> -> vector<4x256xf32>
    %c1_i32 = arith.constant 1 : i32
    %25 = vector.broadcast %c1_i32 : i32 to vector<1x256xi32>
    %26 = arith.addi %2, %25 : vector<1x256xi32>
    %c0_i32_8 = arith.constant 0 : i32
    %27 = vector.broadcast %c0_i32_8 : i32 to vector<1x256xi32>
    %28 = arith.cmpi sge, %26, %27 : vector<1x256xi32>
    %c1_i32_9 = arith.constant 1 : i32
    %29 = vector.broadcast %c1_i32_9 : i32 to vector<1x256xi32>
    %30 = arith.addi %2, %29 : vector<1x256xi32>
    %c16_i32_10 = arith.constant 16 : i32
    %31 = vector.broadcast %c16_i32_10 : i32 to vector<1x256xi32>
    %32 = arith.cmpi slt, %30, %31 : vector<1x256xi32>
    %33 = arith.andi %28, %32 : vector<1x256xi1>
    %cst_11 = arith.constant 0.000000e+00 : f32
    %34 = vector.broadcast %cst_11 : f32 to vector<4x256xf32>
    %35 = vector.shape_cast %33 : vector<1x256xi1> to vector<1x256xi1>
    %36 = vector.broadcast %35 : vector<1x256xi1> to vector<4x256xi1>
    %37 = arith.select %36, %24, %34 : vector<4x256xi1>, vector<4x256xf32>
    %cst_12 = arith.constant 0.000000e+00 : f32
    %38 = vector.broadcast %cst_12 : f32 to vector<4x1xf32>
    %39 = vector.extract_strided_slice %1 {offsets = [0, 0], sizes = [4, 255], strides = [1, 1]} : vector<4x256xf32> to vector<4x255xf32>
    %40 = tpu.concatenate %38, %39 in 1 : vector<4x1xf32>, vector<4x255xf32> -> vector<4x256xf32>
    %c-1_i32_13 = arith.constant -1 : i32
    %41 = vector.broadcast %c-1_i32_13 : i32 to vector<1x256xi32>
    %42 = arith.addi %2, %41 : vector<1x256xi32>
    %c0_i32_14 = arith.constant 0 : i32
    %43 = vector.broadcast %c0_i32_14 : i32 to vector<1x256xi32>
    %44 = arith.cmpi sge, %42, %43 : vector<1x256xi32>
    %c-1_i32_15 = arith.constant -1 : i32
    %45 = vector.broadcast %c-1_i32_15 : i32 to vector<1x256xi32>
    %46 = arith.addi %2, %45 : vector<1x256xi32>
    %c16_i32_16 = arith.constant 16 : i32
    %47 = vector.broadcast %c16_i32_16 : i32 to vector<1x256xi32>
    %48 = arith.cmpi slt, %46, %47 : vector<1x256xi32>
    %49 = arith.andi %44, %48 : vector<1x256xi1>
    %cst_17 = arith.constant 0.000000e+00 : f32
    %50 = vector.broadcast %cst_17 : f32 to vector<4x256xf32>
    %51 = vector.shape_cast %49 : vector<1x256xi1> to vector<1x256xi1>
    %52 = vector.broadcast %51 : vector<1x256xi1> to vector<4x256xi1>
    %53 = arith.select %52, %40, %50 : vector<4x256xi1>, vector<4x256xf32>
    %cst_18 = arith.constant 0.000000e+00 : f32
    %54 = vector.broadcast %cst_18 : f32 to vector<4x1xf32>
    %55 = vector.extract_strided_slice %1 {offsets = [0, 1], sizes = [4, 255], strides = [1, 1]} : vector<4x256xf32> to vector<4x255xf32>
    %56 = tpu.concatenate %55, %54 in 1 : vector<4x255xf32>, vector<4x1xf32> -> vector<4x256xf32>
    %c1_i32_19 = arith.constant 1 : i32
    %57 = vector.broadcast %c1_i32_19 : i32 to vector<1x256xi32>
    %58 = arith.addi %2, %57 : vector<1x256xi32>
    %c0_i32_20 = arith.constant 0 : i32
    %59 = vector.broadcast %c0_i32_20 : i32 to vector<1x256xi32>
    %60 = arith.cmpi sge, %58, %59 : vector<1x256xi32>
    %c1_i32_21 = arith.constant 1 : i32
    %61 = vector.broadcast %c1_i32_21 : i32 to vector<1x256xi32>
    %62 = arith.addi %2, %61 : vector<1x256xi32>
    %c16_i32_22 = arith.constant 16 : i32
    %63 = vector.broadcast %c16_i32_22 : i32 to vector<1x256xi32>
    %64 = arith.cmpi slt, %62, %63 : vector<1x256xi32>
    %65 = arith.andi %60, %64 : vector<1x256xi1>
    %cst_23 = arith.constant 0.000000e+00 : f32
    %66 = vector.broadcast %cst_23 : f32 to vector<4x256xf32>
    %67 = vector.shape_cast %65 : vector<1x256xi1> to vector<1x256xi1>
    %68 = vector.broadcast %67 : vector<1x256xi1> to vector<4x256xi1>
    %69 = arith.select %68, %56, %66 : vector<4x256xi1>, vector<4x256xf32>
    %cst_24 = arith.constant 0.000000e+00 : f32
    %70 = vector.broadcast %cst_24 : f32 to vector<4x15xf32>
    %71 = vector.extract_strided_slice %1 {offsets = [0, 15], sizes = [4, 241], strides = [1, 1]} : vector<4x256xf32> to vector<4x241xf32>
    %72 = tpu.concatenate %71, %70 in 1 : vector<4x241xf32>, vector<4x15xf32> -> vector<4x256xf32>
    %c-1_i32_25 = arith.constant -1 : i32
    %73 = vector.broadcast %c-1_i32_25 : i32 to vector<1x256xi32>
    %74 = arith.addi %2, %73 : vector<1x256xi32>
    %c0_i32_26 = arith.constant 0 : i32
    %75 = vector.broadcast %c0_i32_26 : i32 to vector<1x256xi32>
    %76 = arith.cmpi sge, %74, %75 : vector<1x256xi32>
    %c-1_i32_27 = arith.constant -1 : i32
    %77 = vector.broadcast %c-1_i32_27 : i32 to vector<1x256xi32>
    %78 = arith.addi %2, %77 : vector<1x256xi32>
    %c16_i32_28 = arith.constant 16 : i32
    %79 = vector.broadcast %c16_i32_28 : i32 to vector<1x256xi32>
    %80 = arith.cmpi slt, %78, %79 : vector<1x256xi32>
    %81 = arith.andi %76, %80 : vector<1x256xi1>
    %cst_29 = arith.constant 0.000000e+00 : f32
    %82 = vector.broadcast %cst_29 : f32 to vector<4x256xf32>
    %83 = vector.shape_cast %81 : vector<1x256xi1> to vector<1x256xi1>
    %84 = vector.broadcast %83 : vector<1x256xi1> to vector<4x256xi1>
    %85 = arith.select %84, %72, %82 : vector<4x256xi1>, vector<4x256xf32>
    %cst_30 = arith.constant 0.000000e+00 : f32
    %86 = vector.broadcast %cst_30 : f32 to vector<4x16xf32>
    %87 = vector.extract_strided_slice %1 {offsets = [0, 16], sizes = [4, 240], strides = [1, 1]} : vector<4x256xf32> to vector<4x240xf32>
    %88 = tpu.concatenate %87, %86 in 1 : vector<4x240xf32>, vector<4x16xf32> -> vector<4x256xf32>
    %cst_31 = arith.constant 0.000000e+00 : f32
    %89 = vector.broadcast %cst_31 : f32 to vector<4x17xf32>
    %90 = vector.extract_strided_slice %1 {offsets = [0, 17], sizes = [4, 239], strides = [1, 1]} : vector<4x256xf32> to vector<4x239xf32>
    %91 = tpu.concatenate %90, %89 in 1 : vector<4x239xf32>, vector<4x17xf32> -> vector<4x256xf32>
    %c1_i32_32 = arith.constant 1 : i32
    %92 = vector.broadcast %c1_i32_32 : i32 to vector<1x256xi32>
    %93 = arith.addi %2, %92 : vector<1x256xi32>
    %c0_i32_33 = arith.constant 0 : i32
    %94 = vector.broadcast %c0_i32_33 : i32 to vector<1x256xi32>
    %95 = arith.cmpi sge, %93, %94 : vector<1x256xi32>
    %c1_i32_34 = arith.constant 1 : i32
    %96 = vector.broadcast %c1_i32_34 : i32 to vector<1x256xi32>
    %97 = arith.addi %2, %96 : vector<1x256xi32>
    %c16_i32_35 = arith.constant 16 : i32
    %98 = vector.broadcast %c16_i32_35 : i32 to vector<1x256xi32>
    %99 = arith.cmpi slt, %97, %98 : vector<1x256xi32>
    %100 = arith.andi %95, %99 : vector<1x256xi1>
    %cst_36 = arith.constant 0.000000e+00 : f32
    %101 = vector.broadcast %cst_36 : f32 to vector<4x256xf32>
    %102 = vector.shape_cast %100 : vector<1x256xi1> to vector<1x256xi1>
    %103 = vector.broadcast %102 : vector<1x256xi1> to vector<4x256xi1>
    %104 = arith.select %103, %91, %101 : vector<4x256xi1>, vector<4x256xf32>
    %105 = tpu.concatenate %18, %21, %37, %53, %1, %69, %85, %88, %104 in 0 : vector<4x256xf32>, vector<4x256xf32>, vector<4x256xf32>, vector<4x256xf32>, vector<4x256xf32>, vector<4x256xf32>, vector<4x256xf32>, vector<4x256xf32>, vector<4x256xf32> -> vector<36x256xf32>
    %c0_37 = arith.constant 0 : index
    %c0_38 = arith.constant 0 : index
    %106 = vector.load %arg2[%c0_37, %c0_38] : memref<16x36xf32, #tpu.memory_space<vmem>>, vector<16x36xf32>
    %cst_39 = arith.constant dense<0.000000e+00> : vector<16x256xf32>
    %107 = tpu.matmul %106, %105, %cst_39 {dimension_numbers = #tpu.dot_dimension_numbers<[1], [0], [0], [1], [0, 0, 1, 1], [], []>} : vector<16x36xf32>, vector<36x256xf32>, vector<16x256xf32> -> vector<16x256xf32>
    %c0_40 = arith.constant 0 : index
    %c0_41 = arith.constant 0 : index
    %108 = vector.load %arg3[%c0_40, %c0_41] : memref<16x1xf32, #tpu.memory_space<vmem>>, vector<16x1xf32>
    %109 = vector.broadcast %108 : vector<16x1xf32> to vector<16x256xf32>
    %110 = arith.addf %107, %109 : vector<16x256xf32>
    %c0_42 = arith.constant 0 : index
    %c0_43 = arith.constant 0 : index
    %c0_44 = arith.constant 0 : index
    %111 = vector.load %arg5[%c0_42, %c0_43, %c0_44] : memref<1x16x256xf32, #tpu.memory_space<vmem>>, vector<1x16x256xf32>
    %112 = vector.shape_cast %111 : vector<1x16x256xf32> to vector<16x256xf32>
    %113 = vector.shape_cast %110 : vector<16x256xf32> to vector<1x16x256xf32>
    tpu.vector_store %arg5[%c0_42, %c0_43, %c0_44], %113 {strides = array<i32>} : memref<1x16x256xf32, #tpu.memory_space<vmem>>, vector<1x16x256xf32>,
    return
  }
  func.func @transform_0(%arg0: i32) -> (i32, i32, i32) {
    %c0_i32 = arith.constant 0 : i32
    %c0_i32_0 = arith.constant 0 : i32
    %c0_i32_1 = arith.constant 0 : i32
    return %arg0, %c0_i32, %c0_i32_0 : i32, i32, i32
  }
  func.func @transform_1(%arg0: i32) -> (i32, i32) {
    %c0_i32 = arith.constant 0 : i32
    %c0_i32_0 = arith.constant 0 : i32
    %c0_i32_1 = arith.constant 0 : i32
    return %c0_i32, %c0_i32_0 : i32, i32
  }
  func.func @transform_2(%arg0: i32) -> (i32, i32) {
    %c0_i32 = arith.constant 0 : i32
    %c0_i32_0 = arith.constant 0 : i32
    %c0_i32_1 = arith.constant 0 : i32
    return %c0_i32, %c0_i32_0 : i32, i32
  }
  func.func @transform_3(%arg0: i32) -> (i32, i32) {
    %c0_i32 = arith.constant 0 : i32
    %c0_i32_0 = arith.constant 0 : i32
    %c0_i32_1 = arith.constant 0 : i32
    return %c0_i32, %c0_i32_0 : i32, i32
  }
  func.func @transform_4(%arg0: i32) -> (i32, i32, i32) {
    %c0_i32 = arith.constant 0 : i32
    %c0_i32_0 = arith.constant 0 : i32
    %c0_i32_1 = arith.constant 0 : i32
    return %arg0, %c0_i32, %c0_i32_0 : i32, i32, i32
  }
}

</mosaic_0001>

<bundles_post_ra>
// kernel: tpu_custom_call.1
= control target key start
LH: loop header
LB: loop body
LE: loop exit
PB: predicated region body
PF: predicated region fallthrough
CT: control target
= control target key end

     0   :  { %9 = vsyncpa [#allocation3], 0  ;;  %s993_s0 = inlined_call_operand.vmem [shape: f32[2,4,256], index: 0, kind: input, shape index: {}]   ;;  %s994_s1 = inlined_call_operand.hbm [shape: f32[16,36], index: 1, kind: input, shape index: {}]   ;;  %s995_s2 = inlined_call_operand.vmem [shape: f32[16,1], index: 2, kind: input, shape index: {}]   ;;  %s996_s3 = inlined_call_operand.vmem [shape: s32[1,256], index: 3, kind: input, shape index: {}]   ;;  %s997_s4 = inlined_call_operand.hbm [shape: f32[2,16,256], index: 4, kind: output, shape index: {}]  }
   0x1   :  { %10 = vsyncpa [#allocation4], 0 }
   0x2   :  { %12 = vsyncpa [#allocation4 + $0x1], 0  ;;  %s783_s15 = smov 0   ;;  %s785_s16 = smov 0  }
   0x3   :  { %s787_s17 = smov 0   ;;  %s789_s18 = smov 0  }
   0x4 LB: > { %s804_s19 = sadd.s32 4294967295, %s741_s18   ;;  %s555_s20 = sadd.s32 4294967294, %s741_s18   ;;  %s741_s18 = sphi %s789_s18, %s1005_s18   ;;  %s737_s17 = sphi %s787_s17, %s1004_s17   ;;  %s733_s16 = sphi %s785_s16, %s1003_s16   ;;  %s729_s15 = sphi %s783_s15, %s1002_s15  }
   0x5   : > { %s808_s21 = sadd.s32 1, %s741_s18   ;;  %s114_s22 = sadd.s32 1, %s737_s17 }
   0x6   : > { %s111_s23 = ssub.s32 %s741_s18, %s808_s21  ;;  %p124_p0 = scmp.ne.s32.totalorder %s737_s17, %s733_s16 }
   0x7   : > { %p112_p1 = scmp.eq.s32.totalorder %s111_s23, 0  ;;  %p125_p2 = scmp.eq.s32.totalorder %s804_s19, 1 }
   0x8   : > { %p130_p3 = scmp.ne.s32.totalorder %s733_s16, %s729_s15  ;;  %p131_p4 = scmp.eq.s32.totalorder %s555_s20, 1 }
   0x9   : > { %s819_s24 = scalar_select %p112_p1, %s737_s17, %s114_s22  }
   0xa   : > { %p821_p5 = por %p125_p2, %p124_p0  ;;  %p825_p6 = por %p131_p4, %p130_p3 }
   0xb   : > { %p556_p7 = scmp.ge.s32.totalorder %s741_s18, 1  ;;  %p138_p8 = scmp.lt.s32.totalorder %s741_s18, 3 }
   0xc   : > { %s999_s26 = scalar_select %p825_p6, 1, 0 }
   0xd   : > { %p599_p9 = scmp.eq.s32.totalorder %s804_s19, 0  ;;  %p832_p10 = pnand %p556_p7, %p138_p8 }
   0xe   : > { %s743_s28 = smov [#allocation2]  }
   0xf   : > { %s150_s29 = sshll.u32 %s743_s28, 4  ;;  %p591_p11 = pneg %p832_p10  ;;  %s151_s29 = int_to_ptr.vmem [resolvable:$true] %s150_s29 }
  0x10   : > { %s662_s30 = scalar_lea.vmem %s151_s29, 256  ;;  %p670_p3 = scmp.lt.s32.totalorder %s151_s29, %s151_s29 }
  0x11   : > { %p592_p12 = pnand %p599_p9, %p591_p11  ;;  %p663_p0 = scmp.ne.s32.totalorder %s151_s29, %s662_s30 }
  0x12   : > { %p671_p4 = scmp.lt.s32.totalorder %s662_s30, %s662_s30 }
  0x13   : > { %p653_p13 = pneg %p592_p12 }
  0x14   : > { %p672_p6 = por %p671_p4, %p670_p3 }
  0x15   : > { %p665_p1 = pnand %p663_p0, %p653_p13 }
  0x17   : > { %p666_p2 = pneg %p665_p1 }
  0x19   : > { %p673_p7 = pnand %p672_p6, %p666_p2 }
  0x1b   : > { %676 = shalt.err (!%p673_p7)
}
  0x1c   : > { %s744_s5 = smov 128   ;;  %s745_s6 = smov 8  }
  0x1d   : > { %594 = dma.hbm_to_vmem [thread:$0]  (!%p592_p12), %s994_s1, 256, %s151_s29, [#allocation3], %s744_s5, %s744_s5, %s745_s6  }
  0x1e   : > { %180 = sbr.rel (%p832_p10) target bundleno = 402 (0x192), region = 36 }
  0x23   : > { %720 = dma.done.wait (%p599_p9), [#allocation3], 256  }
  0x24   : > { %722 = vsyncadd (%p599_p9), [#allocation3], 4294967040  ;;  %p206_p8 = scmp.lt.s32.totalorder %s804_s19, 1  ;;  %v746_v0 = vmov 0   ;;  %s747_s14 = smov 111   ;;  %v752_v3 = vmov 0.0   ;;  %v229_v8 = vlaneseq }
  0x25   : > { %649 = vset.pattern.permute.xlu1 %v746_v0  ;;  %648 = vset.pattern.permute.xlu0 %v746_v0  ;;  %s748_s20 = smov 112   ;;  %s749_s22 = smov 127   ;;  %v362_v4 = vld [vmem:[%s995_s2 + $0x8] sm:$0xff]  ;;  %v361_v5 = vld [vmem:[%s995_s2] sm:$0xff]  ;;  %vm290_vm6 = vcmask 1039360   ;;  %vm312_vm7 = vcmask 916480  }
  0x26   : > { %s207_s9 = scalar_select %p206_p8, %s804_s19, 1  ;;  %450 = vmatprep.mubr.f32.mxu0 %v752_v3  ;;  %456 = vmatprep.mubr.f32.mxu1 %v752_v3  ;;  %v212_v6 = vld [vmem:[%s996_s3] sm:$0x3]  ;;  %v230_v10 = vshrl.u32 %v229_v8, 7  ;;  %vm301_vm9 = vcmask 924672   ;;  %vm320_vm10 = vcmask 908288  }
  0x27   : > { %s750_s23 = smov 113   ;;  %s751_s27 = smov 1   ;;  %v258_v7 = vadd.s32 1, %v212_v6  ;;  %v224_v9 = vadd.s32 4294967295, %v212_v6  ;;  %vm350_vm13 = vcmask 1043456   ;;  %vm279_vm15 = vcmask 7168  }
  0x28   : > { %s573_s10 = sshll.u32 %s207_s9, 3  ;;  %s753_s28 = smov 15   ;;  %v235_v11 = vsub.s32 1, %v230_v10  ;;  %v231_v13 = vsub.s32 0, %v230_v10 }
  0x29   : > { %s210_s13 = scalar_lea.vmem %s993_s0, %s573_s10  ;;  %s754_s29 = smov 16   ;;  %vm259_vm0 = vcmp.ge.s32.totalorder %v258_v7, 0  ;;  %vm260_vm1 = vcmp.lt.s32.totalorder %v258_v7, 16  ;;  %vm225_vm2 = vcmp.ge.s32.totalorder %v224_v9, 0  ;;  %vm226_vm3 = vcmp.lt.s32.totalorder %v224_v9, 16 }
  0x2a   : > { %v854_v1 = vld [vmem:[%s210_s13] sm:$0xff]  ;;  %s755_s30 = smov 17   ;;  %vm261_vm4 = vmand %vm259_vm0, %vm260_vm1  ;;  %vm253_vm0 = vcmask 121856   ;;  %vm245_vm1 = vcmask 130048   ;;  %s203_s11 = sand.u32 1, %s733_s16  }
  0x2b   : > { %316 = vrot.lane.b32.xlu1 %v854_v1, %s747_s14  ;;  %308 = vrot.lane.b32.xlu0 %v854_v1, %s748_s20  ;;  %v860_v2 = vcombine.high %v854_v1, %v854_v1  ;;  %vm227_vm5 = vmand %vm225_vm2, %vm226_vm3  ;;  %v262_v12 = vsel %vm261_vm4, 1, %v746_v0  ;;  %vm219_vm2 = vcmask 138240   ;;  %vm373_vm3 = vcmask 293888   ;;  %s561_s12 = sshll.u32 %s203_s11, 5 }
  0x2c   : > { %v228_v16 = vsel %vm227_vm5, 1, %v746_v0  ;;  %v887_v17 = vrot.slane %v262_v12, %v235_v11  ;;  %v891_v19 = vrot.slane %v262_v12, %v231_v13  ;;  %s205_s13 = scalar_lea.vmem [#allocation5], %s561_s12 }
  0x2d   : > { %v889_v18 = vrot.slane %v228_v16, %v235_v11  ;;  %v897_v24 = vrot.slane %v228_v16, %v231_v13  ;;  %v360_v16 = vld [vmem:[#allocation2 + $0x8] sm:$0xff] }
  0x2e   : > { %vm272_vm8 = vcmp.eq.s32.totalorder %v887_v17, 1  ;;  %vm271_vm12 = vcmp.eq.s32.totalorder %v891_v19, 1 }
  0x2f   : > { %288 = vrot.lane.b32.xlu1 %v860_v2, %s749_s22  ;;  %310 = vrot.lane.b32.xlu0 %v860_v2, %s748_s20  ;;  %vm238_vm11 = vcmp.eq.s32.totalorder %v889_v18, 1  ;;  %vm237_vm14 = vcmp.eq.s32.totalorder %v897_v24, 1  ;;  %s574_s20 = sshll.u32 %s804_s19, 9  ;;  %s952_s19 = scalar_lea.sflag [#allocation4], %s203_s11 }
  0x33   : > { %299 = vrot.lane.b32.xlu1 %v860_v2, %s750_s23  ;;  %318 = vrot.lane.b32.xlu0 %v860_v2, %s747_s14  ;;  %s481_s14 = sshll.u32 %s205_s13, 4  ;;  %s945_s14 = int_to_ptr.vmem [resolvable:$true] %s481_s14 }
  0x37   : > { %297 = vrot.lane.b32.xlu1 %v854_v1, %s750_s23  ;;  %286 = vrot.lane.b32.xlu0 %v854_v1, %s749_s22 }
  0x3b   : > { %277 = vrot.lane.b32.xlu1 %v860_v2, %s751_s27  ;;  %275 = vrot.lane.b32.xlu0 %v854_v1, %s751_s27  ;;  %s950_s27 = scalar_lea.hbm %s997_s4, %s574_s20 }
  0x3f   : > { %251 = vrot.lane.b32.xlu1 %v860_v2, %s753_s28  ;;  %249 = vrot.lane.b32.xlu0 %v854_v1, %s753_s28  ;;  %s677_s28 = scalar_lea.vmem %s945_s14, 512 }
  0x40   : > { %p678_p6 = scmp.ne.s32.totalorder %s945_s14, %s677_s28 }
  0x42   : > { %p679_p9 = pnand %p678_p6, %p821_p5 }
  0x43   : > { %243 = vrot.lane.b32.xlu1 %v860_v2, %s754_s29  ;;  %241 = vrot.lane.b32.xlu0 %v854_v1, %s754_s29 }
  0x44   : > { %p680_p10 = pneg %p679_p9 }
  0x47   : > { %217 = vrot.lane.b32.xlu1 %v860_v2, %s755_s30  ;;  %215 = vrot.lane.b32.xlu0 %v854_v1, %s755_s30  ;;  %s756_s30 = smov [#allocation5]  }
  0x48   : > { %s681_s5 = sshll.u32 %s756_s30, 4  ;;  %s682_s5 = int_to_ptr.vmem [resolvable:$false] %s681_s5 }
  0x49   : > { %s683_s6 = scalar_lea.vmem %s682_s5, 1024  ;;  %p684_p11 = scmp.lt.s32.totalorder %s945_s14, %s682_s5 }
  0x4a   : > { %p685_p12 = scmp.lt.s32.totalorder %s683_s6, %s677_s28 }
  0x4b   : > { %370 = vperm.xlu1 %649, %v362_v4   ;;  %365 = vperm.xlu0 %648, %v361_v5  }
  0x4c   : > { %p686_p13 = por %p685_p12, %p684_p11 }
  0x4e   : > { %p687_p0 = pnand %p686_p13, %p680_p10 }
  0x9d   : > { %v317_v14 = vpop.permute.xlu1 %316  ;;  %v309_v15 = vpop.permute.xlu0 %308 }
  0xa1   : > { %v289_v20 = vpop.permute.xlu1 %288  ;;  %v311_v21 = vpop.permute.xlu0 %310 }
  0xa2   : > { %v294_v22 = vsel %vm290_vm6, %v289_v20, 0.0  ;;  %v315_v23 = vsel %vm312_vm7, %v311_v21, 0.0  ;;  %v313_v32 = vsel %vm312_vm7, %v309_v15, %v311_v21  ;;  %v359_v15 = vld [vmem:[#allocation2] sm:$0xff] }
  0xa3   : > { %v296_v25 = vsel %vm272_vm8, %v294_v22, 0.0  ;;  %v347_v28 = vrot.slane %v315_v23, 4  ;;  %v346_v40 = vrot.slane %v313_v32, 4 }
  0xa4   : > { %v342_v37 = vrot.slane %v296_v25, 4 }
  0xa5   : > { %v300_v26 = vpop.permute.xlu1 %299  ;;  %v319_v27 = vpop.permute.xlu0 %318 }
  0xa6   : > { %v305_v29 = vsel %vm301_vm9, %v300_v26, 0.0  ;;  %v321_v30 = vsel %vm320_vm10, %v317_v14, %v319_v27  ;;  %v324_v31 = vsel %vm320_vm10, %v319_v27, 0.0  ;;  %v356_v49 = vsel %vm350_vm13, %v860_v2, %v342_v37 }
  0xa7   : > { %v307_v33 = vsel %vm238_vm11, %v305_v29, 0.0  ;;  %v326_v34 = vsel %vm272_vm8, %v324_v31, 0.0  ;;  %v325_v35 = vsel %vm271_vm12, %v321_v30, 0.0 }
  0xa8   : > { %564 = vmatprep.subr.msk.mxu0 %vm350_vm13, %v326_v34  ;;  %575 = vmatprep.subr.msk.mxu1 %vm350_vm13, %v326_v34  ;;  %v358_v36 = vsel %vm350_vm13, %v307_v33, %v347_v28 }
  0xa9   : > { %v298_v38 = vpop.permute.xlu1 %297  ;;  %565 = vmatpush1.msk.msra.mxu0 %vm350_vm13, %v325_v35  ;;  %580 = vmatpush1.msk.msra.mxu1 %vm350_vm13, %v325_v35  ;;  %v287_v39 = vpop.permute.xlu0 %286 }
  0xaa   : > { %v302_v41 = vsel %vm301_vm9, %v298_v38, %v300_v26  ;;  %v291_v42 = vsel %vm290_vm6, %v287_v39, %v289_v20  ;;  %410 = vmatprep.subr.mxu0 %v358_v36  ;;  %576 = vmatprep.subr.mxu1 %v358_v36 }
  0xab   : > { %v306_v43 = vsel %vm237_vm14, %v302_v41, 0.0  ;;  %v295_v44 = vsel %vm271_vm12, %v291_v42, 0.0 }
  0xac   : > { %v341_v45 = vrot.slane %v295_v44, 4  ;;  %v357_v46 = vsel %vm350_vm13, %v306_v43, %v346_v40 }
  0xad   : > { %v278_v47 = vpop.permute.xlu1 %277  ;;  %411 = vmatpush1.msra.mxu0 %v357_v46  ;;  %581 = vmatpush1.msra.mxu1 %v357_v46  ;;  %v276_v48 = vpop.permute.xlu0 %275 }
  0xae   : > { %v280_v50 = vsel %vm279_vm15, %v276_v48, %v278_v47  ;;  %v283_v51 = vsel %vm279_vm15, 0.0, %v276_v48  ;;  %412 = vmatprep.subr.mxu0 %v356_v49  ;;  %577 = vmatprep.subr.mxu1 %v356_v49  ;;  %v355_v52 = vsel %vm350_vm13, %v854_v1, %v341_v45 }
  0xaf   : > { %v284_v53 = vsel %vm237_vm14, %v283_v51, 0.0  ;;  %v285_v54 = vsel %vm238_vm11, %v280_v50, 0.0  ;;  %413 = vmatpush1.msra.mxu0 %v355_v52  ;;  %582 = vmatpush1.msra.mxu1 %v355_v52 }
  0xb0   : > { %v334_v57 = vrot.slane %v284_v53, 4  ;;  %v335_v58 = vrot.slane %v285_v54, 4 }
  0xb1   : > { %v252_v55 = vpop.permute.xlu1 %251  ;;  %v250_v56 = vpop.permute.xlu0 %249 }
  0xb2   : > { %v254_v59 = vsel %vm253_vm0, %v250_v56, %v252_v55  ;;  %v257_v60 = vsel %vm253_vm0, 0.0, %v250_v56 }
  0xb3   : > { %v273_v61 = vsel %vm271_vm12, %v257_v60, 0.0  ;;  %v274_v62 = vsel %vm272_vm8, %v254_v59, 0.0 }
  0xb4   : > { %v354_v63 = vsel %vm350_vm13, %v274_v62, %v335_v58  ;;  %v353_v0 = vsel %vm350_vm13, %v273_v61, %v334_v57 }
  0xb5   : > { %v244_v1 = vpop.permute.xlu1 %243  ;;  %414 = vmatprep.subr.mxu0 %v354_v63  ;;  %578 = vmatprep.subr.mxu1 %v354_v63  ;;  %v242_v2 = vpop.permute.xlu0 %241 }
  0xb6   : > { %415 = vmatpush1.msra.mxu0 %v353_v0  ;;  %583 = vmatpush1.msra.mxu1 %v353_v0  ;;  %v246_v3 = vsel %vm245_vm1, %v242_v2, %v244_v1  ;;  %v248_v4 = vsel %vm245_vm1, 0.0, %v242_v2 }
  0xb7   : > { %v328_v7 = vrot.slane %v248_v4, 4  ;;  %v329_v8 = vrot.slane %v246_v3, 4 }
  0xb9   : > { %v218_v5 = vpop.permute.xlu1 %217  ;;  %v216_v6 = vpop.permute.xlu0 %215 }
  0xba   : > { %v220_v9 = vsel %vm219_vm2, %v216_v6, %v218_v5  ;;  %v223_v10 = vsel %vm219_vm2, 0.0, %v216_v6 }
  0xbb   : > { %v239_v11 = vsel %vm237_vm14, %v223_v10, 0.0  ;;  %v240_v12 = vsel %vm238_vm11, %v220_v9, 0.0 }
  0xbc   : > { %v352_v13 = vsel %vm350_vm13, %v240_v12, %v329_v8  ;;  %v351_v14 = vsel %vm350_vm13, %v239_v11, %v328_v7 }
  0xbd   : > { %416 = vmatprep.subr.mxu0 %v352_v13  ;;  %579 = vmatprep.subr.mxu1 %v352_v13 }
  0xbe   : > { %417 = vmatpush1.msra.mxu0 %v351_v14  ;;  %584 = vmatpush1.msra.mxu1 %v351_v14 }
  0xbf   : > { %566 = vmatmul.mubr.msk.f32.vlgmr.msra.gmra.mxu0 %vm373_vm3, %v359_v15  ;;  %567 = vmatmul.mubr.msk.f32.vlgmr.msra.gmra.mxu1 %vm373_vm3, %v360_v16 }
  0xc6   : > { %v371_v17 = vpop.permute.xlu1 %370  ;;  %v366_v19 = vpop.permute.xlu0 %365 }
 0x17f   : > { %v452_v18 = vpop.f32.mrf.mxu0  ;;  %v458_v20 = vpop.f32.mrf.mxu1 }
 0x180   : > { %v459_v21 = vadd.f32 %v458_v20, %v371_v17  ;;  %v453_v22 = vadd.f32 %v452_v18, %v366_v19 }
 0x181   : > { %v454_v23 = vpop.f32.mrf.mxu0  ;;  %v460_v24 = vpop.f32.mrf.mxu1 }
 0x182   : > { %465 = vst [vmem:[%s205_s13 + $0x10] sm:$0xff] %v459_v21  ;;  %463 = vst [vmem:[%s205_s13] sm:$0xff] %v453_v22  ;;  %v455_v25 = vadd.f32 %v454_v23, %v366_v19  ;;  %v461_v26 = vadd.f32 %v460_v24, %v371_v17 }
 0x184   : > { %464 = vst [vmem:[%s205_s13 + $0x8] sm:$0xff] %v455_v25  ;;  %466 = vst [vmem:[%s205_s13 + $0x18] sm:$0xff] %v461_v26 }
 0x185   : > { %690 = shalt.err (!%p687_p0)
}
 0x186   : > { %s691_s7 = scalar_lea.hbm %s950_s27, 512  ;;  %s695_s10 = scalar_lea.hbm %s997_s4, 1024 }
 0x187   : > { %p692_p1 = scmp.ne.s32.totalorder %s950_s27, %s691_s7  ;;  %p696_p4 = scmp.lt.s32.totalorder %s950_s27, %s997_s4 }
 0x188   : > { %p697_p7 = scmp.lt.s32.totalorder %s695_s10, %s691_s7 }
 0x189   : > { %p693_p2 = pnand %p692_p1, %p821_p5 }
 0x18a   : > { %p698_p8 = por %p697_p7, %p696_p4 }
 0x18b   : > { %p694_p3 = pneg %p693_p2 }
 0x18d   : > { %p699_p6 = pnand %p698_p8, %p694_p3 }
 0x18f   : > { %702 = shalt.err (!%p699_p6)
}
 0x190   : > { %s757_s13 = smov 256  }
 0x191   : > { %589 = dma.vmem_to_hbm [thread:$0]  (%p821_p5), %s945_s14, 512, %s950_s27, %s952_s19, %s757_s13, %s757_s13, %s754_s29  }
 0x192 PF: > { %p601_p9 = scmp.ge.s32.totalorder %s741_s18, 2  ;;  %s496_s20 = sand.u32 1, %s729_s15  }
 0x193   : > { %p1001_p10 = scmp.ne.s32.totalorder %s999_s26, 0  ;;  %s497_s22 = scalar_lea.sflag [#allocation4], %s496_s20 }
 0x195   : > { %p596_p11 = pnand %p601_p9, %p1001_p10 }
 0x197   : > { %p597_p12 = pneg %p596_p11 }
 0x199   : > { %724 = dma.done.wait (%p597_p12), %s497_s22, 512  }
 0x19a   : > { %726 = vsyncadd (%p597_p12), %s497_s22, 4294966784  ;;  %p15_p13 = scmp.ge.s32.totalorder %s808_s21, 4   ;;  %s1002_s15 = smov %s733_s16 }
 0x19b   : > { %s1003_s16 = smov %s737_s17  ;;  %s1004_s17 = smov %s819_s24 }
 0x19c   : > { %s1005_s18 = smov %s808_s21  ;;  %17 = sbr.rel (!%p15_p13) target bundleno = 4 (0x4), region = 76 }
 0x1a1   :  { %502 = vsyncpa [#allocation3], 1 }
 0x1a2   :  { %504 = vsyncpa [#allocation3 + $0x1], 1 }
 0x1a3   :  { %505 = vsyncpa [#allocation4], 1 }
 0x1a4   :  { %507 = vsyncpa [#allocation4 + $0x1], 1 }

</bundles_post_ra>
